<compile_context>
chip_gen: v7x
topology: tpu7x:2x2x1
jax: 0.10.0
libtpu: 0.0.40
codegen_flags: <defaults>
</compile_context>

<pallas_src>
import functools

import jax
import jax.numpy as jnp
from jax.experimental import pallas as pl
from jax.experimental.pallas import tpu as pltpu

_MIB = 1024 * 1024


def _round_up(n: int, m: int) -> int:
    return ((n + m - 1) // m) * m


def _lm_head_kernel(x_ref, w_ref, b_ref, o_ref, *, compute_dtype):
    # x_ref: (tile_m, E)    activations in the CALLER's dtype (cast here, on the
    #                       VPU, so the HBM stream is read once at native width)
    # w_ref: (E, V_pad)     weight, pre-transposed + cast once in the wrapper
    # b_ref: (1, V_pad)     bias, f32
    # o_ref: (tile_m, V_pad)
    x = x_ref[...].astype(compute_dtype)
    acc = jnp.dot(x, w_ref[...], preferred_element_type=jnp.float32)  # MXU, f32 acc
    acc = acc + b_ref[...].astype(jnp.float32)                        # bias add in f32
    o_ref[...] = acc.astype(o_ref.dtype)


@functools.lru_cache(maxsize=1)
def _generation_defaults():
    """(tile_m_target, vmem_budget_bytes) derived from the local TPU generation."""
    try:
        vmem_bytes = int(pltpu.get_tpu_info().vmem_capacity_bytes)
    except Exception:
        vmem_bytes = 64 * _MIB           # conservative (v7x-safe) fallback
    if vmem_bytes <= 64 * _MIB:          # v7x-like: 64 MiB per-TC VMEM, 2 TCs
        return 1024, 28 * _MIB
    return 2048, 48 * _MIB               # v5e / v6e: 128 MiB VMEM, 1 TC


def lm_head_pallas(
    x_flat,
    weight,
    bias,
    *,
    compute_dtype=jnp.bfloat16,
    out_dtype=None,
    tile_m=None,
    vmem_budget_bytes=None,
    return_padded_vocab=False,
):
    """logits = x_flat @ weight.T + bias.

    x_flat: (M, E); weight: (V, E) PyTorch nn.Linear layout; bias: (V,).
    Returns (M, V) (or (M, V_pad), V_pad if return_padded_vocab) in out_dtype
    (default: x_flat.dtype); f32 accumulation inside the kernel.
    """
    M, E = x_flat.shape
    V = weight.shape[0]
    out_dtype = x_flat.dtype if out_dtype is None else jnp.dtype(out_dtype)

    tm_target, budget_default = _generation_defaults()
    tile_m = tm_target if tile_m is None else tile_m
    vmem_budget_bytes = budget_default if vmem_budget_bytes is None else vmem_budget_bytes

    # --- lane-dense output: pad vocab to a multiple of 128 (CTC vocab ~32) and
    # pre-transpose the weight ONCE to (E, V_pad). The weight is tiny, so the
    # pad + cast + transpose fuse into one cheap wrapper-side op; the kernel
    # then runs a canonical (m,k)@(k,n) MXU matmul.
    V_pad = _round_up(V, 128)
    w = weight.astype(compute_dtype)
    b = bias.astype(jnp.float32)
    if V_pad != V:
        w = jnp.pad(w, ((0, V_pad - V), (0, 0)))
        b = jnp.pad(b, (0, V_pad - V))
    w_t = w.T                     # (E, V_pad)
    b2d = b.reshape(1, V_pad)

    x_isz = jnp.dtype(x_flat.dtype).itemsize
    w_isz = jnp.dtype(compute_dtype).itemsize
    o_isz = jnp.dtype(out_dtype).itemsize

    def resident_bytes(tm):
        return (
            2 * tm * E * x_isz          # x blocks (double-buffered, caller dtype)
            + 2 * tm * V_pad * o_isz    # out blocks (double-buffered)
            + 2 * E * V_pad * w_isz     # weight (constant block index)
            + 2 * V_pad * 4             # bias
            + tm * E * w_isz            # in-kernel compute-dtype copy of the x tile
            + tm * V_pad * 4            # f32 accumulator before the store cast
        )

    # Row tiling: target >= 2 grid steps whenever M allows, so ("parallel",)
    # can shard across both v7x TensorCores (free elsewhere), then shrink the
    # tile until the working set fits the generation-aware VMEM budget.
    tm_cap = max(8, _round_up(pl.cdiv(M, 2), 8))
    tm = max(8, min(_round_up(tile_m, 8), tm_cap))
    while tm > 8 and resident_bytes(tm) > vmem_budget_bytes:
        tm = max(8, _round_up(tm // 2, 8))

    # VMEM limit = actual working set + headroom (not a blanket 48 MiB).
    vmem_limit = int(min(max(resident_bytes(tm) + 6 * _MIB, 16 * _MIB), 56 * _MIB))

    grid = (pl.cdiv(M, tm),)   # ragged last block: OOB stores are masked by Pallas
    cost = pl.CostEstimate(
        flops=2 * M * E * V_pad,
        transcendentals=0,
        bytes_accessed=(M * E * x_isz
                        + E * V_pad * w_isz
                        + V_pad * 4
                        + M * V_pad * o_isz),
    )

    # TODO(synk): for subword vocabs (V >= ~4k) add a vocab grid axis with
    # per-step (E, tn) weight blocks so the weight never has to be fully
    # VMEM-resident; kept single-axis since the CTC head has V ~ 32.
    out = pl.pallas_call(
        functools.partial(_lm_head_kernel, compute_dtype=compute_dtype),
        out_shape=jax.ShapeDtypeStruct((M, V_pad), out_dtype),
        grid_spec=pltpu.PrefetchScalarGridSpec(
            num_scalar_prefetch=0,
            grid=grid,
            in_specs=[
                # Activations: streamed row tile, double-buffered by Pallas.
                # (pl.Buffered(3) only if xprof shows exposed DMA on v7x.)
                pl.BlockSpec((tm, E), lambda i: (i, 0)),
                # Weight / bias: constant block index -> DMA'd once, resident.
                # (Default buffering kept for portability; the redundant second
                #  copy of this small weight is negligible.)
                pl.BlockSpec((E, V_pad), lambda i: (0, 0)),
                pl.BlockSpec((1, V_pad), lambda i: (0, 0)),
            ],
            out_specs=pl.BlockSpec((tm, V_pad), lambda i: (i, 0)),
        ),
        compiler_params=pltpu.CompilerParams(
            dimension_semantics=("parallel",),   # row tiles are independent
            vmem_limit_bytes=vmem_limit,
        ),
        cost_estimate=cost,
    )(x_flat, w_t, b2d)

    if return_padded_vocab:
        return out, V_pad
    return out[:, :V]


def speech_recognition_head_forward(
    x,
    weight,
    bias,
    *,
    skip_first_token=False,
    dropout_prob=0.0,
    compute_dtype=jnp.bfloat16,
    out_dtype=None,
    tile_m=None,
):
    """x: (B, T, E); weight: (V, E) [PyTorch nn.Linear layout]; bias: (V,)."""
    V, E_w = weight.shape

    # For a CTC-sized vocab (V <= E) it is cheaper to run the head on all T
    # tokens and drop token 0 from the narrow logits than to materialize a
    # sliced HBM copy of the wide activations before the kernel.
    slice_logits_after = skip_first_token and V <= E_w
    if skip_first_token and not slice_logits_after:
        x = x[:, 1:, :]

    # Dropout: inference-mode identity, matches nn.Dropout in eval().
    # TODO(synk): training-mode dropout (random mask + 1/(1-p) scale) not implemented.
    del dropout_prob

    B, T, E = x.shape
    out_padded, V_pad = lm_head_pallas(
        x.reshape(B * T, E), weight, bias,
        compute_dtype=compute_dtype, out_dtype=out_dtype, tile_m=tile_m,
        return_padded_vocab=True)

    # Fold the vocab-pad slice and the skip_first_token slice into ONE XLA
    # slice on the (free) reshape.
    logits = out_padded.reshape(B, T, V_pad)
    if slice_logits_after:
        return logits[:, 1:, :V]
    return logits[:, :, :V]


if __name__ == "__main__":
    # Small shapes consistent with the module: (batch, seq, embedding) -> vocab.
    B, T, E, V = 2, 8, 32, 32  # wav2vec2-CTC-style tiny vocab
    key = jax.random.PRNGKey(0)
    kx, kw, kb, kx2 = jax.random.split(key, 4)
    x = jax.random.normal(kx, (B, T, E), dtype=jnp.float32)
    # Deterministic synthetic parameters (not a checkpoint load).
    weight = jax.random.normal(kw, (V, E), dtype=jnp.float32) * (1.0 / jnp.sqrt(E))
    bias = jax.random.normal(kb, (V,), dtype=jnp.float32) * 0.01

    def reference(xr, w, b, skip):
        if skip:
            xr = xr[:, 1:, :]
        return jnp.einsum("bte,ve->btv", xr, w) + b

    # 1) Exact-f32 compute path, no skip_first_token.
    fwd_f32 = jax.jit(functools.partial(
        speech_recognition_head_forward,
        skip_first_token=False, dropout_prob=0.1, compute_dtype=jnp.float32))
    out = fwd_f32(x, weight, bias)
    jax.block_until_ready(out)
    assert out.shape == (B, T, V)
    assert jnp.allclose(out, reference(x, weight, bias, False), atol=1e-3, rtol=1e-3)

    # 2) Default bf16-compute path (in-kernel cast) with skip_first_token=True.
    fwd_bf16 = jax.jit(functools.partial(
        speech_recognition_head_forward,
        skip_first_token=True, dropout_prob=0.1))
    out2 = fwd_bf16(x, weight, bias)
    jax.block_until_ready(out2)
    assert out2.shape == (B, T - 1, V)
    assert jnp.allclose(out2, reference(x, weight, bias, True), atol=1e-1, rtol=1e-1)

    # 3) Ragged-M path with NO wrapper-side padding: B*T = 15 rows, 8-row tile
    #    -> grid=(2,), last block ragged (7 rows), OOB stores masked by Pallas.
    x3 = jax.random.normal(kx2, (3, 5, E), dtype=jnp.float32)
    fwd_ragged = jax.jit(functools.partial(
        speech_recognition_head_forward,
        skip_first_token=False, dropout_prob=0.0,
        compute_dtype=jnp.float32, tile_m=8))
    out3 = fwd_ragged(x3, weight, bias)
    jax.block_until_ready(out3)
    assert out3.shape == (3, 5, V)
    assert jnp.allclose(out3, reference(x3, weight, bias, False), atol=1e-3, rtol=1e-3)

    # 4) bf16 output path (halves logits writeback), f32 compute for accuracy.
    fwd_bf16_out = jax.jit(functools.partial(
        speech_recognition_head_forward,
        skip_first_token=False, dropout_prob=0.0,
        compute_dtype=jnp.float32, out_dtype=jnp.bfloat16))
    out4 = fwd_bf16_out(x, weight, bias)
    jax.block_until_ready(out4)
    assert out4.shape == (B, T, V) and out4.dtype == jnp.bfloat16
    assert jnp.allclose(out4.astype(jnp.float32), reference(x, weight, bias, False),
                        atol=5e-2, rtol=5e-2)

    print("KERNEL_OK")
</pallas_src>

<mosaic_0001>
module attributes {stable_mosaic.version = 11 : i64} {
  func.func @_lm_head_kernel(%arg0: i32, %arg1: memref<8x32xf32, #tpu.memory_space<vmem>>, %arg2: memref<32x128xf32, #tpu.memory_space<vmem>>, %arg3: memref<1x128xf32, #tpu.memory_space<vmem>>, %arg4: memref<8x128xf32, #tpu.memory_space<vmem>>) attributes {dimension_semantics = [#tpu.dimension_semantics<parallel>], iteration_bounds = array<i64: 2>, scalar_prefetch = 0 : i64, scratch_operands = 0 : i64, tpu.core_type = #tpu.core_type<tc>, window_params = [{transform_indices = @transform_0, window_bounds = array<i64: 8, 32>}, {pipeline_mode = #tpu.pipeline_mode<synchronous>, transform_indices = @transform_1, window_bounds = array<i64: 32, 128>}, {pipeline_mode = #tpu.pipeline_mode<synchronous>, transform_indices = @transform_2, window_bounds = array<i64: 1, 128>}, {transform_indices = @transform_3, window_bounds = array<i64: 8, 128>}]} {
    %c0 = arith.constant 0 : index
    %c0_0 = arith.constant 0 : index
    %0 = vector.load %arg1[%c0, %c0_0] : memref<8x32xf32, #tpu.memory_space<vmem>>, vector<8x32xf32>
    %c0_1 = arith.constant 0 : index
    %c0_2 = arith.constant 0 : index
    %1 = vector.load %arg2[%c0_1, %c0_2] : memref<32x128xf32, #tpu.memory_space<vmem>>, vector<32x128xf32>
    %cst = arith.constant dense<0.000000e+00> : vector<8x128xf32>
    %2 = tpu.matmul %0, %1, %cst {dimension_numbers = #tpu.dot_dimension_numbers<[1], [0], [0], [1], [0, 0, 1, 1], [], []>} : vector<8x32xf32>, vector<32x128xf32>, vector<8x128xf32> -> vector<8x128xf32>
    %c0_3 = arith.constant 0 : index
    %c0_4 = arith.constant 0 : index
    %3 = vector.load %arg3[%c0_3, %c0_4] : memref<1x128xf32, #tpu.memory_space<vmem>>, vector<1x128xf32>
    %4 = vector.broadcast %3 : vector<1x128xf32> to vector<8x128xf32>
    %5 = arith.addf %2, %4 : vector<8x128xf32>
    %c0_5 = arith.constant 0 : index
    %c0_6 = arith.constant 0 : index
    %6 = vector.load %arg4[%c0_5, %c0_6] : memref<8x128xf32, #tpu.memory_space<vmem>>, vector<8x128xf32>
    tpu.vector_store %arg4[%c0_5, %c0_6], %5 {strides = array<i32>} : memref<8x128xf32, #tpu.memory_space<vmem>>, vector<8x128xf32>,
    return
  }
  func.func @transform_0(%arg0: i32) -> (i32, i32) {
    %c0_i32 = arith.constant 0 : i32
    %c0_i32_0 = arith.constant 0 : i32
    return %arg0, %c0_i32 : i32, i32
  }
  func.func @transform_1(%arg0: i32) -> (i32, i32) {
    %c0_i32 = arith.constant 0 : i32
    %c0_i32_0 = arith.constant 0 : i32
    %c0_i32_1 = arith.constant 0 : i32
    return %c0_i32, %c0_i32_0 : i32, i32
  }
  func.func @transform_2(%arg0: i32) -> (i32, i32) {
    %c0_i32 = arith.constant 0 : i32
    %c0_i32_0 = arith.constant 0 : i32
    %c0_i32_1 = arith.constant 0 : i32
    return %c0_i32, %c0_i32_0 : i32, i32
  }
  func.func @transform_3(%arg0: i32) -> (i32, i32) {
    %c0_i32 = arith.constant 0 : i32
    %c0_i32_0 = arith.constant 0 : i32
    return %arg0, %c0_i32 : i32, i32
  }
}

</mosaic_0001>

<bundles_post_ra>
// kernel: speech_recognition_head_forward.1
= control target key start
LH: loop header
LB: loop body
LE: loop exit
PB: predicated region body
PF: predicated region fallthrough
CT: control target
= control target key end

     0   :  { %8 = vsyncpa [#allocation3], 0  ;;  %s605_s0 = inlined_call_operand.vmem [shape: f32[16,32], index: 0, kind: input, shape index: {}]   ;;  %s606_s1 = inlined_call_operand.vmem [shape: f32[32,128], index: 1, kind: input, shape index: {}]   ;;  %s607_s2 = inlined_call_operand.vmem [shape: f32[1,128], index: 2, kind: input, shape index: {}]   ;;  %s608_s3 = inlined_call_operand.hbm [shape: f32[16,128], index: 3, kind: output, shape index: {}]  }
   0x1   :  { %10 = vsyncpa [#allocation3 + $0x1], 0  ;;  %s490_s12 = smov 0   ;;  %s492_s13 = smov 0  }
   0x2   :  { %s494_s14 = smov 0   ;;  %s496_s15 = smov 0  }
   0x3 LB: > { %s511_s16 = sadd.s32 4294967295, %s464_s15   ;;  %s326_s17 = sadd.s32 4294967294, %s464_s15   ;;  %s464_s15 = sphi %s496_s15, %s614_s15   ;;  %s460_s14 = sphi %s494_s14, %s613_s14   ;;  %s456_s13 = sphi %s492_s13, %s612_s13   ;;  %s452_s12 = sphi %s490_s12, %s611_s12  }
   0x4   : > { %s515_s18 = sadd.s32 1, %s464_s15   ;;  %s91_s19 = sadd.s32 1, %s460_s14 }
   0x5   : > { %s88_s20 = ssub.s32 %s464_s15, %s515_s18  ;;  %p101_p0 = scmp.ne.s32.totalorder %s460_s14, %s456_s13 }
   0x6   : > { %p89_p1 = scmp.eq.s32.totalorder %s88_s20, 0  ;;  %p102_p2 = scmp.eq.s32.totalorder %s511_s16, 1 }
   0x7   : > { %p107_p3 = scmp.ne.s32.totalorder %s456_s13, %s452_s12  ;;  %p108_p4 = scmp.eq.s32.totalorder %s326_s17, 1 }
   0x8   : > { %s526_s21 = scalar_select %p89_p1, %s460_s14, %s91_s19  }
   0x9   : > { %p528_p5 = por %p102_p2, %p101_p0  ;;  %p532_p6 = por %p108_p4, %p107_p3 }
   0xa   : > { %p329_p7 = scmp.ge.s32.totalorder %s464_s15, 1  ;;  %p139_p8 = scmp.lt.s32.totalorder %s464_s15, 3 }
   0xc   : > { %p140_p9 = pnand %p329_p7, %p139_p8 }
   0xd   : > { %v167_v0 = vld [vmem:[%s606_s1] sm:$0xff] (!%p140_p9)  ;;  %v168_v1 = vld [vmem:[%s606_s1 + $0x8] sm:$0xff] (!%p140_p9)  ;;  %v169_v2 = vld [vmem:[%s606_s1 + $0x10] sm:$0xff] (!%p140_p9)  ;;  %v466_v3 = vmov (!%p140_p9), 0.0|0.0   ;;  %vm467_vm0 = vmmov (!%p140_p9), 0   ;;  %v468_v6 = vmov (!%p140_p9), 0.0  }
   0xe   : > { %143 = sbr.rel (%p140_p9) target bundleno = 254 (0xfe), region = 32  ;;  %354 = vmatprep.subr.bf16.mxu0 (!%p140_p9), %v466_v3  ;;  %v355_v4 = vpack.c.bf16 (!%p140_p9), %v168_v1, %v167_v0  ;;  %v170_v5 = vld [vmem:[%s606_s1 + $0x18] sm:$0xff] (!%p140_p9)  ;;  %351 = vmatprep.mubr.msk.f32.mxu0 (!%p140_p9), %vm467_vm0, %v468_v6  ;;  %p162_p10 = scmp.lt.s32.totalorder (!%p140_p9), %s511_s16, 1  ;;  %vm178_vm1 = vcmask (!%p140_p9), 261120   ;;  %v332_v9 = vld [vmem:[%s607_s2] ss:$0 sm:$0xff] (!%p140_p9) }
   0xf   : > { %v358_v7 = vpack.c.bf16 (!%p140_p9), %v170_v5, %v169_v2  ;;  %s159_s10 = sand.u32 (!%p140_p9), 1, %s456_s13   ;;  %s335_s20 = sshll.u32 (!%p140_p9), %s511_s16, 7 }
  0x10   : > { %356 = vmatpush3.bf16.msra.mxu0 (!%p140_p9), %v355_v4  ;;  %s330_s11 = sshll.u32 (!%p140_p9), %s159_s10, 3  ;;  %s563_s28 = scalar_lea.hbm (!%p140_p9), %s608_s3, %s335_s20 }
  0x11   : > { %357 = vmatprep.subr.bf16.mxu0 (!%p140_p9), %v466_v3  ;;  %s161_s24 = scalar_lea.vmem (!%p140_p9), [#allocation2], %s330_s11  ;;  %s254_s29 = scalar_lea.sflag (!%p140_p9), [#allocation3], %s159_s10 }
  0x12   : > { %s267_s25 = sshll.u32 (!%p140_p9), %s161_s24, 4  ;;  %s565_s25 = int_to_ptr.vmem [resolvable:$true] %s267_s25 }
  0x13   : > { %s402_s30 = scalar_lea.vmem (!%p140_p9), %s565_s25, 128 }
  0x14   : > { %359 = vmatpush3.bf16.msra.mxu0 (!%p140_p9), %v358_v7  ;;  %p403_p11 = scmp.ne.s32.totalorder (!%p140_p9), %s565_s25, %s402_s30 }
  0x15   : > { %s163_s5 = scalar_select %p162_p10, %s511_s16, 1 }
  0x16   : > { %p404_p12 = pnand %p403_p11, %p528_p5  ;;  %s469_s16 = smov [#allocation2]  }
  0x17   : > { %s331_s6 = sshll.u32 %s163_s5, 3  ;;  %s406_s4 = sshll.u32 %s469_s16, 4  ;;  %s407_s4 = int_to_ptr.vmem [resolvable:$false] %s406_s4 }
  0x18   : > { %s165_s9 = scalar_lea.vmem %s605_s0, %s331_s6  ;;  %p405_p13 = pneg %p404_p12 }
  0x19   : > { %v166_v8 = vld [vmem:[%s165_s9] sm:$0xff]  ;;  %s408_s5 = scalar_lea.vmem %s407_s4, 256  ;;  %p409_p0 = scmp.lt.s32.totalorder %s565_s25, %s407_s4 }
  0x1a   : > { %352 = vmatmul.mubr.msk.f32.vlgmr.msra.gmra.mrb[0].mxu0 %vm178_vm1, %v166_v8  ;;  %p410_p1 = scmp.lt.s32.totalorder %s408_s5, %s402_s30 }
  0x1c   : > { %p411_p2 = por %p410_p1, %p409_p0 }
  0x1e   : > { %p412_p3 = pnand %p411_p2, %p405_p13 }
  0xed   : > { %v248_v10 = vpop.f32.mrb[0].mxu0 }
  0xee   : > { %v249_v11 = vadd.f32 %v332_v9, %v248_v10  ;;  %v353_v12 = vpop.f32.mrb[1].mxu0 }
  0xf0   : > { %252 = vst [vmem:[%s161_s24] sm:$0xff] %v249_v11 }
  0xf1   : > { %415 = shalt.err (!%p412_p3)
}
  0xf2   : > { %s416_s6 = scalar_lea.hbm %s563_s28, 128  ;;  %s420_s9 = scalar_lea.hbm %s608_s3, 256 }
  0xf3   : > { %p417_p4 = scmp.ne.s32.totalorder %s563_s28, %s416_s6  ;;  %p421_p9 = scmp.lt.u32.totalorder %s563_s28, %s608_s3 }
  0xf4   : > { %p422_p10 = scmp.lt.u32.totalorder %s420_s9, %s416_s6  ;;  %p424_p12 = scmp.lt.u32.totalorder %s416_s6, %s563_s28 }
  0xf5   : > { %p418_p7 = pnand %p417_p4, %p528_p5 }
  0xf6   : > { %p423_p11 = por %p422_p10, %p421_p9 }
  0xf7   : > { %p419_p8 = pneg %p418_p7 }
  0xf8   : > { %p425_p13 = por %p424_p12, %p423_p11 }
  0xfa   : > { %p426_p0 = pnand %p425_p13, %p419_p8 }
  0xfc   : > { %429 = shalt.err (!%p426_p0)
}
  0xfd   : > { %360 = dma.vmem_to_hbm [thread:$0]  (%p528_p5), %s565_s25, 128, %s563_s28, %s254_s29  }
  0xfe PF: > { %p366_p1 = scmp.ge.s32.totalorder %s464_s15, 2  ;;  %s279_s17 = sand.u32 1, %s452_s12  }
  0xff   : > { %s280_s19 = scalar_lea.sflag [#allocation3], %s279_s17 }
 0x100   : > { %p363_p2 = pnand %p366_p1, %p532_p6 }
 0x102   : > { %447 = dma.done.wait (!%p363_p2), %s280_s19, 128  }
 0x103   : > { %449 = vsyncadd (!%p363_p2), %s280_s19, 4294967168  ;;  %p13_p3 = scmp.ge.s32.totalorder %s515_s18, 4   ;;  %s611_s12 = smov %s456_s13 }
 0x104   : > { %s612_s13 = smov %s460_s14  ;;  %s613_s14 = smov %s526_s21 }
 0x105   : > { %s614_s15 = smov %s515_s18  ;;  %15 = sbr.rel (!%p13_p3) target bundleno = 3 (0x3), region = 67 }
 0x10c   :  { %285 = vsyncpa [#allocation3], 1 }
 0x10d   :  { %287 = vsyncpa [#allocation3 + $0x1], 1 }

</bundles_post_ra>
